<compile_context>
chip_gen: v5e
topology: v5e:2x2
jax: 0.10.0
libtpu: 0.0.40
codegen_flags: <defaults>
</compile_context>

<pallas_src>
import jax
import jax.numpy as jnp
from jax.experimental import pallas as pl
from jax.experimental.pallas import tpu as pltpu


def _round_up(x: int, m: int) -> int:
    return ((x + m - 1) // m) * m


# ---------------------------------------------------------------------------
# Pallas kernel: fused pointwise-conv head on a (C, TILE_S) slab.
#   h      = relu(W1ᵀ @ x + b1)        (HID, TILE_S)
#   logits = W2ᵀ @ h + b2              (2,   TILE_S)   <- lane-dense store
# ---------------------------------------------------------------------------
def _dins_head_kernel(x_ref, w1t_ref, b1_ref, w2t_ref, b2_ref, o_ref):
    x = x_ref[...]                                           # (C, TILE_S)
    # K=3 contraction: MXU is <1% utilized but the kernel is HBM-bound, so the
    # matmul form is kept for simplicity; accumulation is f32.
    h = jnp.dot(w1t_ref[...], x, preferred_element_type=jnp.float32)
    h = jnp.maximum(h + b1_ref[...], 0.0)                    # (HID, TILE_S)
    o = jnp.dot(w2t_ref[...], h, preferred_element_type=jnp.float32)
    o_ref[...] = (o + b2_ref[...]).astype(o_ref.dtype)       # (2, TILE_S)


def dins_head(x_bcs, w1t, b1, w2t, b2, *, max_tile_s: int = 16384):
    """x_bcs: (B, C, S) float32 -> (B, 2, S) float32 logits (pointwise head)."""
    B, C, S = x_bcs.shape
    HID = w1t.shape[0]
    NOUT = w2t.shape[0]

    # Choose a lane-dense tile: multiple of 128, as large as possible up to
    # max_tile_s, with minimal tail padding.
    n_tiles = pl.cdiv(S, max_tile_s)
    tile_s = _round_up(pl.cdiv(S, n_tiles), 128)
    s_pad = tile_s * n_tiles
    if s_pad != S:
        x_bcs = jnp.pad(x_bcs, ((0, 0), (0, 0), (0, s_pad - S)))

    out = pl.pallas_call(
        _dins_head_kernel,
        out_shape=jax.ShapeDtypeStruct((B, NOUT, s_pad), jnp.float32),
        grid_spec=pltpu.PrefetchScalarGridSpec(
            num_scalar_prefetch=0,
            grid=(B, n_tiles),
            in_specs=[
                # activations: (C, TILE_S) slab, batch dim squeezed out
                pl.BlockSpec((None, C, tile_s), lambda b, s: (b, 0, s)),
                # weights / biases: tiny, resident across the whole grid
                pl.BlockSpec((HID, C), lambda b, s: (0, 0)),
                pl.BlockSpec((HID, 1), lambda b, s: (0, 0)),
                pl.BlockSpec((NOUT, HID), lambda b, s: (0, 0)),
                pl.BlockSpec((NOUT, 1), lambda b, s: (0, 0)),
            ],
            out_specs=pl.BlockSpec((None, NOUT, tile_s), lambda b, s: (b, 0, s)),
        ),
        compiler_params=pltpu.CompilerParams(
            dimension_semantics=("parallel", "parallel"),
        ),
    )(x_bcs, w1t, b1, w2t, b2)

    if s_pad != S:
        out = out[:, :, :S]
    return out


# ---------------------------------------------------------------------------
# DINsNetwork forward (wrapper semantics reproduced from the PyTorch module)
# ---------------------------------------------------------------------------
class DINsNetworkPallas:
    def __init__(self, in_channels: int, hidden: int = 32, seed: int = 0):
        k = jax.random.PRNGKey(seed)
        k1, k2, k3, k4 = jax.random.split(k, 4)
        # Weights stored transposed ((out, in)) so the kernel's matmuls are
        # W1ᵀ @ x and W2ᵀ @ h with spatial columns as the lane axis.
        self.w1t = (jax.random.normal(k1, (hidden, in_channels), jnp.float32)
                    * (1.0 / jnp.sqrt(in_channels)))
        self.b1 = jax.random.normal(k2, (hidden, 1), jnp.float32) * 0.01
        self.w2t = (jax.random.normal(k3, (2, hidden), jnp.float32)
                    * (1.0 / jnp.sqrt(hidden)))
        self.b2 = jax.random.normal(k4, (2, 1), jnp.float32) * 0.01

    def __call__(self, x):
        # x: (B, C, H, W, D) channels-first 3D volume (image ch 0, guide rest).
        b, c, h, w, d = x.shape
        # The PyTorch wrapper permutes to channels-last, splits into image /
        # guide (then the body sees them re-concatenated => no-op), runs the
        # ONNX model and permutes back.  For a pointwise head the permutes are
        # mathematically irrelevant, so we compute directly in the native
        # layout with the flattened spatial axis as the lane dimension — no
        # transposes, no split/concat, output reshapes straight back.
        rows = x.reshape(b, c, h * w * d).astype(jnp.float32)          # (B,C,S)
        logits = dins_head(rows, self.w1t, self.b1, self.w2t, self.b2)  # (B,2,S)
        return logits.reshape(b, 2, h, w, d).astype(jnp.float32)


if __name__ == "__main__":
    # Small shapes: batch=2, channels=3 (1 image + 2 guidance), spatial 8x8x8.
    B, C, H, W, D = 2, 3, 8, 8, 8
    key = jax.random.PRNGKey(0)
    x = jax.random.normal(key, (B, C, H, W, D), jnp.float32)

    net = DINsNetworkPallas(in_channels=C, hidden=32, seed=0)
    out = net(x)
    out = jax.block_until_ready(out)

    assert out.shape == (B, 2, H, W, D), out.shape
    assert out.dtype == jnp.float32

    # Pure-JAX reference of the stand-in head (same math, no Pallas).
    rows = x.reshape(B, C, -1).astype(jnp.float32)
    h_ref = jnp.maximum(
        jnp.einsum("hc,bcs->bhs", net.w1t, rows) + net.b1[None], 0.0)
    ref = (jnp.einsum("oh,bhs->bos", net.w2t, h_ref)
           + net.b2[None]).reshape(B, 2, H, W, D)
    assert bool(jnp.allclose(out, ref, atol=1e-4, rtol=1e-4))

    print("KERNEL_OK")
</pallas_src>

<mosaic_0001>
module attributes {stable_mosaic.version = 11 : i64} {
  func.func @_dins_head_kernel(%arg0: i32, %arg1: i32, %arg2: memref<1x3x512xf32, #tpu.memory_space<vmem>>, %arg3: memref<32x3xf32, #tpu.memory_space<vmem>>, %arg4: memref<32x1xf32, #tpu.memory_space<vmem>>, %arg5: memref<2x32xf32, #tpu.memory_space<vmem>>, %arg6: memref<2x1xf32, #tpu.memory_space<vmem>>, %arg7: memref<1x2x512xf32, #tpu.memory_space<vmem>>) attributes {dimension_semantics = [#tpu.dimension_semantics<parallel>, #tpu.dimension_semantics<parallel>], iteration_bounds = array<i64: 2, 1>, scalar_prefetch = 0 : i64, scratch_operands = 0 : i64, tpu.core_type = #tpu.core_type<tc>, window_params = [{transform_indices = @transform_0, window_bounds = array<i64: 1, 3, 512>}, {pipeline_mode = #tpu.pipeline_mode<synchronous>, transform_indices = @transform_1, window_bounds = array<i64: 32, 3>}, {pipeline_mode = #tpu.pipeline_mode<synchronous>, transform_indices = @transform_2, window_bounds = array<i64: 32, 1>}, {pipeline_mode = #tpu.pipeline_mode<synchronous>, transform_indices = @transform_3, window_bounds = array<i64: 2, 32>}, {pipeline_mode = #tpu.pipeline_mode<synchronous>, transform_indices = @transform_4, window_bounds = array<i64: 2, 1>}, {transform_indices = @transform_5, window_bounds = array<i64: 1, 2, 512>}]} {
    %c0 = arith.constant 0 : index
    %c0_0 = arith.constant 0 : index
    %c0_1 = arith.constant 0 : index
    %0 = vector.load %arg2[%c0, %c0_0, %c0_1] : memref<1x3x512xf32, #tpu.memory_space<vmem>>, vector<1x3x512xf32>
    %1 = vector.shape_cast %0 : vector<1x3x512xf32> to vector<3x512xf32>
    %c0_2 = arith.constant 0 : index
    %c0_3 = arith.constant 0 : index
    %2 = vector.load %arg3[%c0_2, %c0_3] : memref<32x3xf32, #tpu.memory_space<vmem>>, vector<32x3xf32>
    %cst = arith.constant dense<0.000000e+00> : vector<32x512xf32>
    %3 = tpu.matmul %2, %1, %cst {dimension_numbers = #tpu.dot_dimension_numbers<[1], [0], [0], [1], [0, 0, 1, 1], [], []>} : vector<32x3xf32>, vector<3x512xf32>, vector<32x512xf32> -> vector<32x512xf32>
    %c0_4 = arith.constant 0 : index
    %c0_5 = arith.constant 0 : index
    %4 = vector.load %arg4[%c0_4, %c0_5] : memref<32x1xf32, #tpu.memory_space<vmem>>, vector<32x1xf32>
    %5 = vector.broadcast %4 : vector<32x1xf32> to vector<32x512xf32>
    %6 = arith.addf %3, %5 : vector<32x512xf32>
    %cst_6 = arith.constant 0.000000e+00 : f32
    %7 = vector.broadcast %cst_6 : f32 to vector<32x512xf32>
    %8 = arith.maximumf %6, %7 : vector<32x512xf32>
    %c0_7 = arith.constant 0 : index
    %c0_8 = arith.constant 0 : index
    %9 = vector.load %arg5[%c0_7, %c0_8] : memref<2x32xf32, #tpu.memory_space<vmem>>, vector<2x32xf32>
    %cst_9 = arith.constant dense<0.000000e+00> : vector<2x512xf32>
    %10 = tpu.matmul %9, %8, %cst_9 {dimension_numbers = #tpu.dot_dimension_numbers<[1], [0], [0], [1], [0, 0, 1, 1], [], []>} : vector<2x32xf32>, vector<32x512xf32>, vector<2x512xf32> -> vector<2x512xf32>
    %c0_10 = arith.constant 0 : index
    %c0_11 = arith.constant 0 : index
    %11 = vector.load %arg6[%c0_10, %c0_11] : memref<2x1xf32, #tpu.memory_space<vmem>>, vector<2x1xf32>
    %12 = vector.broadcast %11 : vector<2x1xf32> to vector<2x512xf32>
    %13 = arith.addf %10, %12 : vector<2x512xf32>
    %c0_12 = arith.constant 0 : index
    %c0_13 = arith.constant 0 : index
    %c0_14 = arith.constant 0 : index
    %14 = vector.load %arg7[%c0_12, %c0_13, %c0_14] : memref<1x2x512xf32, #tpu.memory_space<vmem>>, vector<1x2x512xf32>
    %15 = vector.shape_cast %14 : vector<1x2x512xf32> to vector<2x512xf32>
    %16 = vector.shape_cast %13 : vector<2x512xf32> to vector<1x2x512xf32>
    tpu.vector_store %arg7[%c0_12, %c0_13, %c0_14], %16 {strides = array<i32>} : memref<1x2x512xf32, #tpu.memory_space<vmem>>, vector<1x2x512xf32>,
    return
  }
  func.func @transform_0(%arg0: i32, %arg1: i32) -> (i32, i32, i32) {
    %c0_i32 = arith.constant 0 : i32
    %c0_i32_0 = arith.constant 0 : i32
    return %arg0, %c0_i32, %arg1 : i32, i32, i32
  }
  func.func @transform_1(%arg0: i32, %arg1: i32) -> (i32, i32) {
    %c0_i32 = arith.constant 0 : i32
    %c0_i32_0 = arith.constant 0 : i32
    %c0_i32_1 = arith.constant 0 : i32
    return %c0_i32, %c0_i32_0 : i32, i32
  }
  func.func @transform_2(%arg0: i32, %arg1: i32) -> (i32, i32) {
    %c0_i32 = arith.constant 0 : i32
    %c0_i32_0 = arith.constant 0 : i32
    %c0_i32_1 = arith.constant 0 : i32
    return %c0_i32, %c0_i32_0 : i32, i32
  }
  func.func @transform_3(%arg0: i32, %arg1: i32) -> (i32, i32) {
    %c0_i32 = arith.constant 0 : i32
    %c0_i32_0 = arith.constant 0 : i32
    %c0_i32_1 = arith.constant 0 : i32
    return %c0_i32, %c0_i32_0 : i32, i32
  }
  func.func @transform_4(%arg0: i32, %arg1: i32) -> (i32, i32) {
    %c0_i32 = arith.constant 0 : i32
    %c0_i32_0 = arith.constant 0 : i32
    %c0_i32_1 = arith.constant 0 : i32
    return %c0_i32, %c0_i32_0 : i32, i32
  }
  func.func @transform_5(%arg0: i32, %arg1: i32) -> (i32, i32, i32) {
    %c0_i32 = arith.constant 0 : i32
    %c0_i32_0 = arith.constant 0 : i32
    return %arg0, %c0_i32, %arg1 : i32, i32, i32
  }
}

</mosaic_0001>

<bundles_post_ra>
// kernel: tpu_custom_call.1
= control target key start
LH: loop header
LB: loop body
LE: loop exit
PB: predicated region body
PF: predicated region fallthrough
CT: control target
= control target key end

     0   :  { %10 = vsyncpa [#allocation3], 0  ;;  %s1000_s0 = inlined_call_operand.vmem [shape: f32[2,3,512], index: 0, kind: input, shape index: {}]   ;;  %s1001_s1 = inlined_call_operand.vmem [shape: f32[32,3], index: 1, kind: input, shape index: {}]   ;;  %s1002_s2 = inlined_call_operand.vmem [shape: f32[32,1], index: 2, kind: input, shape index: {}]   ;;  %s1003_s3 = inlined_call_operand.vmem [shape: f32[2,32], index: 3, kind: input, shape index: {}]   ;;  %s1004_s4 = inlined_call_operand.vmem [shape: f32[2,1], index: 4, kind: input, shape index: {}]   ;;  %s1005_s5 = inlined_call_operand.hbm [shape: f32[2,2,512], index: 5, kind: output, shape index: {}]  }
   0x1   :  { %12 = vsyncpa [#allocation3 + $0x1], 0  ;;  %s857_s18 = smov 0   ;;  %s859_s19 = smov 0  }
   0x2   :  { %s861_s20 = smov 0   ;;  %s863_s21 = smov 0  }
   0x3   :  { %s865_s22 = smov 0   ;;  %s867_s23 = smov 0  }
   0x4 LB: > { %s648_s24 = sadd.s32 4294967295, %s824_s23   ;;  %s649_s25 = sadd.s32 4294967294, %s824_s23   ;;  %s824_s23 = sphi %s867_s23, %s18_s23   ;;  %s820_s22 = sphi %s865_s22, %s1012_s22   ;;  %s816_s21 = sphi %s863_s21, %s1011_s21   ;;  %s812_s20 = sphi %s861_s20, %s1010_s20   ;;  %s808_s19 = sphi %s859_s19, %s1009_s19   ;;  %s804_s18 = sphi %s857_s18, %s1008_s18  }
   0x5   : > { %s30_s26 = sadd.s32 1, %s820_s22  ;;  %s151_s27 = sadd.s32 1, %s812_s20 }
   0x6   : > { %p32_p0 = scmp.ge.s32.totalorder %s30_s26, 2  ;;  %p161_p1 = scmp.ne.s32.totalorder %s812_s20, %s808_s19 }
   0x7   : > { %p162_p2 = scmp.eq.s32.totalorder %s648_s24, 1  ;;  %p167_p3 = scmp.ne.s32.totalorder %s808_s19, %s804_s18 }
   0x8   : > { %s1014_s26 = smov (%p32_p0, %s30_s26), 0  ;;  %p168_p5 = scmp.eq.s32.totalorder %s649_s25, 1 }
   0x9   : > { %p897_p4 = por %p162_p2, %p161_p1  ;;  %s146_s29 = ssub.s32 %s820_s22, %s1014_s26 }
   0xa   : > { %p652_p6 = scmp.ge.s32.totalorder %s824_s23, 1  ;;  %p149_p7 = scmp.eq.s32.totalorder %s146_s29, 0 }
   0xb   : > { %p904_p8 = por %p168_p5, %p167_p3  ;;  %p211_p9 = scmp.lt.s32.totalorder %s824_s23, 3 }
   0xc   : > { %s910_s6 = scalar_select %p149_p7, %s812_s20, %s151_s27  }
   0xd   : > { %p212_p10 = pnand %p652_p6, %p211_p9 }
   0xe   : > { %p244_p11 = scmp.lt.s32.totalorder (!%p212_p10), %s816_s21, 1  ;;  %s240_s17 = sand.u32 (!%p212_p10), 1, %s808_s19  }
   0xf   : > { %215 = sbr.rel (%p212_p10) target bundleno = 344 (0x158), region = 40  ;;  %s653_s24 = sshll.u32 (!%p212_p10), %s240_s17, 3 }
  0x10   : > { %s686_s25 = sshll.u32 (!%p212_p10), %s816_s21, 3  ;;  %s242_s8 = scalar_lea.vmem (!%p212_p10), [#allocation2], %s653_s24 }
  0x11   : > { %s567_s7 = scalar_lea.hbm (!%p212_p10), %s1005_s5, %s686_s25  ;;  %s766_s15 = scalar_lea.hbm (!%p212_p10), %s1005_s5, 16 }
  0x14   : > { %v826_v0 = vmov 0   ;;  %v261_v1 = vld [vmem:[%s1002_s2 + $0x8] sm:$0xff]  ;;  %s245_s9 = scalar_select %p244_p11, %s816_s21, 1  ;;  %v260_v4 = vld [vmem:[%s1002_s2] sm:$0xff]  ;;  %v263_v5 = vld [vmem:[%s1002_s2 + $0x18] sm:$0xff]  ;;  %vm306_vm0 = vcmask 1042432  }
  0x15   : > { %744 = vset.pattern.permute.xlu1 %v826_v0  ;;  %743 = vset.pattern.permute.xlu0 %v826_v0  ;;  %v256_v6 = vld [vmem:[%s1001_s1] sm:$0xff]  ;;  %vm293_vm1 = vcmask 23552   ;;  %v262_v11 = vld [vmem:[%s1002_s2 + $0x10] sm:$0xff]  ;;  %v257_v12 = vld [vmem:[%s1001_s1 + $0x8] sm:$0xff]  ;;  %vm454_vm2 = vcmask 261120   ;;  %vm547_vm3 = vcmask 1045508  }
  0x16   : > { %271 = vperm.xlu1 %744, %v261_v1   ;;  %745 = vset.pattern.permute.xlu2 %v826_v0  ;;  %s685_s10 = sshll.u32 %s245_s9, 4  ;;  %v258_v13 = vld [vmem:[%s1001_s1 + $0x10] sm:$0xff]  ;;  %v259_v14 = vld [vmem:[%s1001_s1 + $0x18] sm:$0xff]  ;;  %v448_v21 = vld [vmem:[%s1004_s4] sm:$0x3]  ;;  %vm545_vm4 = vcmask 1041408  }
  0x17   : > { %s251_s13 = scalar_lea.vmem %s1000_s0, %s685_s10  ;;  %281 = vperm.xlu0 %743, %v263_v5   ;;  %451 = vperm.xlu2 %745, %v448_v21   ;;  %v447_v0 = vld [vmem:[%s1003_s3] sm:$0x3]  ;;  %s569_s9 = sshll.u32 %s242_s8, 4  ;;  %vm549_vm5 = vcmask 1043456   ;;  %s570_s9 = int_to_ptr.vmem [resolvable:$true] %s569_s9 }
  0x18   : > { %v254_v2 = vld [vmem:[%s251_s13] sm:$0x77]  ;;  %v255_v3 = vld [vmem:[%s251_s13 + $0x8] sm:$0x77]  ;;  %s571_s10 = sshll.u32 %s567_s7, 4  ;;  %s554_s21 = scalar_lea.sflag [#allocation3], %s240_s17  ;;  %s572_s10 = int_to_ptr.hbm [resolvable:$true] %s571_s10 }
  0x19   : > { %286 = vst [vmem:[#allocation1] ss:$2 sm:$0xff] %v254_v2  ;;  %s760_s11 = sshra.s32 %s572_s10, 4  ;;  %s761_s11 = int_to_ptr.hbm [resolvable:$true] %s760_s11 }
  0x1a   : > { %288 = vst [vmem:[#allocation1 + $0x10] ss:$2 sm:$0xff] %v255_v3  ;;  %s762_s12 = scalar_lea.hbm %s761_s11, 8  ;;  %p767_p1 = scmp.lt.s32.totalorder %s761_s11, %s1005_s5 }
  0x1b   : > { %p763_p12 = scmp.ne.s32.totalorder %s761_s11, %s762_s12  ;;  %p768_p2 = scmp.lt.s32.totalorder %s766_s15, %s762_s12 }
  0x1d   : > { %p764_p13 = pnand %p763_p12, %p897_p4  ;;  %p769_p3 = por %p768_p2, %p767_p1 }
  0x1e   : > { %266 = vperm.xlu1 %744, %v260_v4  }
  0x1f   : > { %276 = vperm.xlu0 %743, %v262_v11   ;;  %p765_p0 = pneg %p764_p13 }
  0x20   : > { %v289_v7 = vld.sshfl [vmem:[#allocation1] sm:$0xff pattern:$0x75316420]  ;;  %v290_v8 = vld.sshfl [vmem:[#allocation1 + $0x8] sm:$0xff pattern:$0x75316420] }
  0x21   : > { %656 = vmatpush.msk.msra.mxu0 %vm306_vm0, %v289_v7  ;;  %661 = vmatpush.msk.msra.mxu1 %vm306_vm0, %v290_v8  ;;  %v291_v9 = vld.sshfl [vmem:[#allocation1 + $0x10] sm:$0xff pattern:$0x75316420]  ;;  %v292_v10 = vld.sshfl [vmem:[#allocation1 + $0x18] sm:$0xff pattern:$0x75316420]  ;;  %p770_p5 = pnand %p769_p3, %p765_p0 }
  0x22   : > { %666 = vmatpush.msk.msra.mxu2 %vm306_vm0, %v291_v9  ;;  %671 = vmatpush.msk.msra.mxu3 %vm306_vm0, %v292_v10 }
  0x23   : > { %657 = vmatmul.msk.f32.vlgmr.msra.gmra.mxu0 %vm293_vm1, %v256_v6  ;;  %662 = vmatmul.msk.f32.vlgmr.msra.gmra.mxu1 %vm293_vm1, %v256_v6 }
  0x24   : > { %667 = vmatmul.msk.f32.vlgmr.msra.gmra.mxu2 %vm293_vm1, %v256_v6  ;;  %672 = vmatmul.msk.f32.vlgmr.msra.gmra.mxu3 %vm293_vm1, %v256_v6 }
  0x2b   : > { %658 = vmatmul.msk.f32.gmra.mxu0 %vm293_vm1, %v257_v12  ;;  %663 = vmatmul.msk.f32.gmra.mxu1 %vm293_vm1, %v257_v12 }
  0x2c   : > { %668 = vmatmul.msk.f32.gmra.mxu2 %vm293_vm1, %v257_v12  ;;  %673 = vmatmul.msk.f32.gmra.mxu3 %vm293_vm1, %v257_v12 }
  0x33   : > { %659 = vmatmul.msk.f32.gmra.mxu0 %vm293_vm1, %v258_v13  ;;  %664 = vmatmul.msk.f32.gmra.mxu1 %vm293_vm1, %v258_v13 }
  0x34   : > { %669 = vmatmul.msk.f32.gmra.mxu2 %vm293_vm1, %v258_v13  ;;  %674 = vmatmul.msk.f32.gmra.mxu3 %vm293_vm1, %v258_v13 }
  0x3b   : > { %660 = vmatmul.msk.f32.gmra.mxu0 %vm293_vm1, %v259_v14  ;;  %665 = vmatmul.msk.f32.gmra.mxu1 %vm293_vm1, %v259_v14 }
  0x3c   : > { %670 = vmatmul.msk.f32.gmra.mxu2 %vm293_vm1, %v259_v14  ;;  %675 = vmatmul.msk.f32.gmra.mxu3 %vm293_vm1, %v259_v14 }
  0x71   : > { %v452_v5 = vpop.permute.xlu2 %451 }
  0x88   : > { %v272_v27 = vpop.permute.xlu1 %271 }
  0x89   : > { %v282_v22 = vpop.permute.xlu0 %281 }
  0x90   : > { %v267_v41 = vpop.permute.xlu1 %266 }
  0x91   : > { %v277_v28 = vpop.permute.xlu0 %276 }
  0xa0   : > { %v332_v15 = vpop.f32.mrf.mxu0  ;;  %v361_v16 = vpop.f32.mrf.mxu1 }
  0xa1   : > { %v333_v44 = vadd.f32 %v332_v15, %v267_v41  ;;  %v362_v45 = vadd.f32 %v361_v16, %v267_v41 }
  0xa3   : > { %v431_v54 = vmax.f32 %v333_v44, 0.0  ;;  %v432_v55 = vmax.f32 %v362_v45, 0.0 }
  0xa7   : > { %v390_v17 = vpop.f32.mrf.mxu2  ;;  %v419_v18 = vpop.f32.mrf.mxu3 }
  0xa8   : > { %v335_v19 = vpop.f32.mrf.mxu0  ;;  %v364_v20 = vpop.f32.mrf.mxu1  ;;  %v391_v60 = vadd.f32 %v390_v17, %v267_v41  ;;  %v420_v61 = vadd.f32 %v419_v18, %v267_v41 }
  0xa9   : > { %v336_v37 = vadd.f32 %v335_v19, %v272_v27  ;;  %v365_v38 = vadd.f32 %v364_v20, %v272_v27 }
  0xaa   : > { %v433_v3 = vmax.f32 %v391_v60, 0.0  ;;  %v434_v4 = vmax.f32 %v420_v61, 0.0 }
  0xab   : > { %v435_v46 = vmax.f32 %v336_v37, 0.0  ;;  %v436_v47 = vmax.f32 %v365_v38, 0.0 }
  0xaf   : > { %v393_v23 = vpop.f32.mrf.mxu2  ;;  %v422_v24 = vpop.f32.mrf.mxu3 }
  0xb0   : > { %v338_v25 = vpop.f32.mrf.mxu0  ;;  %v367_v26 = vpop.f32.mrf.mxu1  ;;  %v394_v56 = vadd.f32 %v393_v23, %v272_v27  ;;  %v423_v57 = vadd.f32 %v422_v24, %v272_v27 }
  0xb1   : > { %v339_v35 = vadd.f32 %v338_v25, %v277_v28  ;;  %v368_v36 = vadd.f32 %v367_v26, %v277_v28 }
  0xb2   : > { %v437_v1 = vmax.f32 %v394_v56, 0.0  ;;  %v438_v2 = vmax.f32 %v423_v57, 0.0 }
  0xb3   : > { %v439_v42 = vmax.f32 %v339_v35, 0.0  ;;  %v440_v43 = vmax.f32 %v368_v36, 0.0 }
  0xb7   : > { %v396_v29 = vpop.f32.mrf.mxu2  ;;  %v425_v30 = vpop.f32.mrf.mxu3 }
  0xb8   : > { %v341_v31 = vpop.f32.mrf.mxu0  ;;  %v370_v32 = vpop.f32.mrf.mxu1  ;;  %v397_v50 = vadd.f32 %v396_v29, %v277_v28  ;;  %v426_v51 = vadd.f32 %v425_v30, %v277_v28 }
  0xb9   : > { %v342_v33 = vadd.f32 %v341_v31, %v282_v22  ;;  %v371_v34 = vadd.f32 %v370_v32, %v282_v22 }
  0xba   : > { %v441_v62 = vmax.f32 %v397_v50, 0.0  ;;  %v442_v63 = vmax.f32 %v426_v51, 0.0 }
  0xbb   : > { %v443_v39 = vmax.f32 %v342_v33, 0.0  ;;  %v444_v40 = vmax.f32 %v371_v34, 0.0 }
  0xbd   : > { %470 = vmatpush.msrb.mxu0 %v443_v39  ;;  %490 = vmatpush.msrb.mxu1 %v444_v40 }
  0xbf   : > { %v399_v48 = vpop.f32.mrf.mxu2  ;;  %v428_v49 = vpop.f32.mrf.mxu3  ;;  %471 = vmatpush.msrb.mxu0 %v439_v42  ;;  %491 = vmatpush.msrb.mxu1 %v440_v43 }
  0xc0   : > { %v400_v52 = vadd.f32 %v399_v48, %v282_v22  ;;  %v429_v53 = vadd.f32 %v428_v49, %v282_v22 }
  0xc1   : > { %472 = vmatpush.msrb.mxu0 %v435_v46  ;;  %492 = vmatpush.msrb.mxu1 %v436_v47 }
  0xc2   : > { %v445_v58 = vmax.f32 %v400_v52, 0.0  ;;  %v446_v59 = vmax.f32 %v429_v53, 0.0 }
  0xc3   : > { %473 = vmatpush.msrb.mxu0 %v431_v54  ;;  %493 = vmatpush.msrb.mxu1 %v432_v55 }
  0xc4   : > { %510 = vmatpush.msrb.mxu2 %v445_v58  ;;  %530 = vmatpush.msrb.mxu3 %v446_v59 }
  0xc5   : > { %677 = vmatmul.msk.f32.vlgmr.msrb.gmra.mxu1 %vm454_vm2, %v447_v0  ;;  %676 = vmatmul.msk.f32.vlgmr.msrb.gmra.mxu0 %vm454_vm2, %v447_v0 }
  0xc6   : > { %511 = vmatpush.msrb.mxu2 %v441_v62  ;;  %531 = vmatpush.msrb.mxu3 %v442_v63 }
  0xc8   : > { %512 = vmatpush.msrb.mxu2 %v437_v1  ;;  %532 = vmatpush.msrb.mxu3 %v438_v2 }
  0xca   : > { %513 = vmatpush.msrb.mxu2 %v433_v3  ;;  %533 = vmatpush.msrb.mxu3 %v434_v4 }
  0xcb   : > { %678 = vmatmul.msk.f32.vlgmr.msrb.gmra.mxu2 %vm454_vm2, %v447_v0  ;;  %679 = vmatmul.msk.f32.vlgmr.msrb.gmra.mxu3 %vm454_vm2, %v447_v0 }
 0x142   : > { %v495_v6 = vpop.f32.mrf.mxu1  ;;  %v475_v8 = vpop.f32.mrf.mxu0 }
 0x143   : > { %v496_v7 = vadd.f32 %v495_v6, %v452_v5  ;;  %v476_v14 = vadd.f32 %v475_v8, %v452_v5 }
 0x145   : > { %v542_v11 = vrot.slane %v496_v7, 6 }
 0x147   : > { %v546_v18 = vsel %vm545_vm4, %v476_v14, %v542_v11 }
 0x14e   : > { %v515_v9 = vpop.f32.mrf.mxu2  ;;  %v535_v10 = vpop.f32.mrf.mxu3 }
 0x14f   : > { %v516_v12 = vadd.f32 %v515_v9, %v452_v5  ;;  %v536_v13 = vadd.f32 %v535_v10, %v452_v5 }
 0x151   : > { %v543_v15 = vrot.slane %v516_v12, 4  ;;  %v544_v16 = vrot.slane %v536_v13, 2 }
 0x153   : > { %v548_v17 = vsel %vm547_vm3, %v543_v15, %v544_v16 }
 0x154   : > { %v550_v19 = vsel %vm549_vm5, %v546_v18, %v548_v17 }
 0x155   : > { %552 = vst [vmem:[%s242_s8] sm:$0xff] %v550_v19 }
 0x156   : > { %773 = shalt.err (!%p770_p5)
}
 0x157   : > { %687 = dma.vmem_to_hbm [thread:$0]  (%p897_p4), %s570_s9, 128, %s572_s10, %s554_s21  }
 0x158 PF: > { %p693_p6 = scmp.ge.s32.totalorder %s824_s23, 2  ;;  %s583_s17 = sand.u32 1, %s804_s18  }
 0x159   : > { %s584_s25 = scalar_lea.sflag [#allocation3], %s583_s17 }
 0x15a   : > { %p690_p7 = pnand %p693_p6, %p904_p8 }
 0x15c   : > { %p691_p9 = pneg %p690_p7 }
 0x15e   : > { %799 = dma.done.wait (%p691_p9), %s584_s25, 128  }
 0x15f   : > { %801 = vsyncadd (%p691_p9), %s584_s25, 4294967168  ;;  %s18_s23 = sadd.s32 1, %s824_s23   ;;  %s1008_s18 = smov %s808_s19 }
 0x160   : > { %p15_p10 = scmp.ge.s32.totalorder %s18_s23, 4   ;;  %s1009_s19 = smov %s812_s20 }
 0x161   : > { %s1010_s20 = smov %s910_s6  ;;  %s1011_s21 = smov %s820_s22 }
 0x162   : > { %s1012_s22 = smov %s1014_s26  ;;  %17 = sbr.rel (!%p15_p10) target bundleno = 4 (0x4), region = 76 }
 0x167   :  { %590 = vsyncpa [#allocation3], 1 }
 0x168   :  { %592 = vsyncpa [#allocation3 + $0x1], 1 }

</bundles_post_ra>
